<compile_context>
chip_gen: v7x
topology: tpu7x:2x2x1
jax: 0.10.0
libtpu: 0.0.40
codegen_flags: <defaults>
</compile_context>

<pallas_src>
import functools

import jax
import jax.numpy as jnp
from jax.experimental import pallas as pl
from jax.experimental.pallas import tpu as pltpu


# ------------------------- trace-time scalar helpers -------------------------
def _scalar_matmul(A, B):
    """Matmul on nested lists of python floats / traced 0-d f32 scalars.

    Constant zeros/ones are folded at trace time, so the emitted kernel only
    contains the handful of scalar multiply-adds the composition actually needs
    (all on the scalar-ALU path, no vregs, no XLU broadcasts).
    """
    n = len(A)
    out = []
    for i in range(n):
        row = []
        for j in range(n):
            acc = 0.0
            for k in range(n):
                a, b = A[i][k], B[k][j]
                if (isinstance(a, float) and a == 0.0) or (
                        isinstance(b, float) and b == 0.0):
                    continue
                if isinstance(a, float) and a == 1.0:
                    term = b
                elif isinstance(b, float) and b == 1.0:
                    term = a
                else:
                    term = a * b
                if isinstance(acc, float) and acc == 0.0:
                    acc = term
                else:
                    acc = acc + term
            row.append(acc)
        out.append(row)
    return out


def _store_matrix(out_ref, mat):
    n = len(mat)
    for i in range(n):
        for j in range(n):
            out_ref[i, j] = jnp.asarray(mat[i][j], dtype=jnp.float32)


# --------------------------------- kernels -----------------------------------
def _affine_kernel_2d(p_ref, out_ref):
    # packed layout: [tx, ty, sx, sy, cos(th), sin(th), shx, shy]
    tx, ty = p_ref[0], p_ref[1]
    sx, sy = p_ref[2], p_ref[3]
    ct, st = p_ref[4], p_ref[5]
    shx, shy = p_ref[6], p_ref[7]

    T = [[1.0, 0.0, tx],
         [0.0, 1.0, ty],
         [0.0, 0.0, 1.0]]
    S = [[sx, 0.0, 0.0],
         [0.0, sy, 0.0],
         [0.0, 0.0, 1.0]]
    R = [[ct, -st, 0.0],
         [st, ct, 0.0],
         [0.0, 0.0, 1.0]]
    Sh = [[1.0, shx, 0.0],
          [shy, 1.0, 0.0],
          [0.0, 0.0, 1.0]]
    M = _scalar_matmul(Sh, _scalar_matmul(R, _scalar_matmul(S, T)))
    _store_matrix(out_ref, M)


def _affine_kernel_3d(p_ref, out_ref):
    # packed layout:
    # [tx,ty,tz, sx,sy,sz, cx,snx,cy,sny,cz,snz, s_yx,s_zx,s_xy,s_zy,s_xz,s_yz]
    tx, ty, tz = p_ref[0], p_ref[1], p_ref[2]
    sx, sy, sz = p_ref[3], p_ref[4], p_ref[5]
    cx, snx = p_ref[6], p_ref[7]
    cy, sny = p_ref[8], p_ref[9]
    cz, snz = p_ref[10], p_ref[11]
    s_yx, s_zx, s_xy = p_ref[12], p_ref[13], p_ref[14]
    s_zy, s_xz, s_yz = p_ref[15], p_ref[16], p_ref[17]

    T = [[1.0, 0.0, 0.0, tx],
         [0.0, 1.0, 0.0, ty],
         [0.0, 0.0, 1.0, tz],
         [0.0, 0.0, 0.0, 1.0]]
    S = [[sx, 0.0, 0.0, 0.0],
         [0.0, sy, 0.0, 0.0],
         [0.0, 0.0, sz, 0.0],
         [0.0, 0.0, 0.0, 1.0]]
    Rx = [[1.0, 0.0, 0.0, 0.0],
          [0.0, cx, -snx, 0.0],
          [0.0, snx, cx, 0.0],
          [0.0, 0.0, 0.0, 1.0]]
    Ry = [[cy, 0.0, sny, 0.0],
          [0.0, 1.0, 0.0, 0.0],
          [-sny, 0.0, cy, 0.0],
          [0.0, 0.0, 0.0, 1.0]]
    Rz = [[cz, -snz, 0.0, 0.0],
          [snz, cz, 0.0, 0.0],
          [0.0, 0.0, 1.0, 0.0],
          [0.0, 0.0, 0.0, 1.0]]
    Sh = [[1.0, s_yx, s_zx, 0.0],
          [s_xy, 1.0, s_zy, 0.0],
          [s_xz, s_yz, 1.0, 0.0],
          [0.0, 0.0, 0.0, 1.0]]
    R = _scalar_matmul(Rz, _scalar_matmul(Ry, Rx))
    M = _scalar_matmul(Sh, _scalar_matmul(R, _scalar_matmul(S, T)))
    _store_matrix(out_ref, M)


# --------------------------------- wrapper ------------------------------------
@functools.partial(jax.jit, static_argnames=("dimensions",))
def affine_matrix_pallas(translation, scale, rotation, shear, *, dimensions):
    rot_dims = 3 if dimensions == 3 else 1
    shear_dims = 6 if dimensions == 3 else 2
    if translation.shape != (dimensions,):
        raise ValueError(f"translation must have shape ({dimensions},)")
    if scale.shape != (dimensions,):
        raise ValueError(f"scale must have shape ({dimensions},)")
    if rotation.shape != (rot_dims,):
        raise ValueError(f"rotation must have shape ({rot_dims},)")
    if shear.shape != (shear_dims,):
        raise ValueError(f"shear must have shape ({shear_dims},)")

    t = translation.astype(jnp.float32)
    s = scale.astype(jnp.float32)
    r = rotation.astype(jnp.float32)
    sh = shear.astype(jnp.float32)

    # Precompute cos/sin in the wrapper (fused by XLA), pack into ONE SMEM vec.
    if dimensions == 2:
        packed = jnp.concatenate([t, s, jnp.cos(r), jnp.sin(r), sh])      # 8
        kernel = _affine_kernel_2d
    else:
        cs = jnp.stack([jnp.cos(r), jnp.sin(r)], axis=-1).reshape(-1)     # cx,snx,cy,sny,cz,snz
        packed = jnp.concatenate([t, s, cs, sh])                          # 18
        kernel = _affine_kernel_3d

    M = dimensions + 1
    return pl.pallas_call(
        kernel,
        out_shape=jax.ShapeDtypeStruct((M, M), jnp.float32),
        in_specs=[pl.BlockSpec(memory_space=pltpu.MemorySpace.SMEM)],
        out_specs=pl.BlockSpec(memory_space=pltpu.MemorySpace.SMEM),
    )(packed)


class AffineTransform:
    """JAX/Pallas analogue of the PyTorch AffineTransform module."""

    def __init__(self, dimensions, translation=None, scale=None, rotation=None,
                 shear=None):
        if dimensions not in (2, 3):
            raise ValueError("AffineTransform is only implemented for 2D and 3D")
        self.dimensions = dimensions
        rot_dims = 3 if dimensions == 3 else 1
        shear_dims = 6 if dimensions == 3 else 2
        self.translation = (jnp.zeros(dimensions, jnp.float32)
                            if translation is None else translation)
        self.scale = jnp.ones(dimensions, jnp.float32) if scale is None else scale
        self.rotation = (jnp.zeros(rot_dims, jnp.float32)
                         if rotation is None else rotation)
        self.shear = (jnp.zeros(shear_dims, jnp.float32)
                      if shear is None else shear)

    def forward(self):
        return affine_matrix_pallas(self.translation, self.scale, self.rotation,
                                    self.shear, dimensions=self.dimensions)

    __call__ = forward


# ---------------- pure-JAX reference (for correctness check) ----------------
def _ref_matrix_2d(translation, scale, rotation, shear):
    tx, ty = translation
    sx, sy = scale
    th = rotation[0]
    shx, shy = shear
    T = jnp.eye(3).at[0, 2].set(tx).at[1, 2].set(ty)
    S = jnp.eye(3).at[0, 0].set(sx).at[1, 1].set(sy)
    R = (jnp.eye(3).at[0, 0].set(jnp.cos(th)).at[1, 0].set(jnp.sin(th))
         .at[0, 1].set(-jnp.sin(th)).at[1, 1].set(jnp.cos(th)))
    Sh = jnp.eye(3).at[0, 1].set(shx).at[1, 0].set(shy)
    return Sh @ R @ S @ T


def _ref_matrix_3d(translation, scale, rotation, shear):
    tx, ty, tz = translation
    sx, sy, sz = scale
    thx, thy, thz = rotation
    s_yx, s_zx, s_xy, s_zy, s_xz, s_yz = shear
    T = jnp.eye(4).at[0, 3].set(tx).at[1, 3].set(ty).at[2, 3].set(tz)
    S = jnp.eye(4).at[0, 0].set(sx).at[1, 1].set(sy).at[2, 2].set(sz)
    Rx = (jnp.eye(4).at[1, 1].set(jnp.cos(thx)).at[1, 2].set(-jnp.sin(thx))
          .at[2, 1].set(jnp.sin(thx)).at[2, 2].set(jnp.cos(thx)))
    Ry = (jnp.eye(4).at[0, 0].set(jnp.cos(thy)).at[0, 2].set(jnp.sin(thy))
          .at[2, 0].set(-jnp.sin(thy)).at[2, 2].set(jnp.cos(thy)))
    Rz = (jnp.eye(4).at[0, 0].set(jnp.cos(thz)).at[0, 1].set(-jnp.sin(thz))
          .at[1, 0].set(jnp.sin(thz)).at[1, 1].set(jnp.cos(thz)))
    R = Rz @ Ry @ Rx
    Sh = (jnp.eye(4).at[0, 1].set(s_yx).at[0, 2].set(s_zx).at[1, 0].set(s_xy)
          .at[1, 2].set(s_zy).at[2, 0].set(s_xz).at[2, 1].set(s_yz))
    return Sh @ R @ S @ T


if __name__ == "__main__":
    key = jax.random.PRNGKey(0)
    ok = True

    # ---- 2D case: params perturbed deterministically around the module init ----
    k0, k1, k2, k3, key = jax.random.split(key, 5)
    t2 = 0.1 * jax.random.normal(k0, (2,), jnp.float32)          # translation
    s2 = 1.0 + 0.05 * jax.random.normal(k1, (2,), jnp.float32)   # scale
    r2 = 0.1 * jax.random.normal(k2, (1,), jnp.float32)          # rotation
    sh2 = 0.05 * jax.random.normal(k3, (2,), jnp.float32)        # shear
    mod2 = AffineTransform(2, t2, s2, r2, sh2)
    m2 = jax.block_until_ready(mod2())
    ref2 = _ref_matrix_2d(t2, s2, r2, sh2)
    ok &= bool(jnp.allclose(m2, ref2, atol=1e-5, rtol=1e-5))
    assert m2.shape == (3, 3)

    # ---- 3D case ----
    k0, k1, k2, k3, key = jax.random.split(key, 5)
    t3 = 0.1 * jax.random.normal(k0, (3,), jnp.float32)
    s3 = 1.0 + 0.05 * jax.random.normal(k1, (3,), jnp.float32)
    r3 = 0.1 * jax.random.normal(k2, (3,), jnp.float32)
    sh3 = 0.05 * jax.random.normal(k3, (6,), jnp.float32)
    mod3 = AffineTransform(3, t3, s3, r3, sh3)
    m3 = jax.block_until_ready(mod3())
    ref3 = _ref_matrix_3d(t3, s3, r3, sh3)
    ok &= bool(jnp.allclose(m3, ref3, atol=1e-5, rtol=1e-5))
    assert m3.shape == (4, 4)

    # ---- default (identity) params ----
    m_id = jax.block_until_ready(AffineTransform(3)())
    ok &= bool(jnp.allclose(m_id, jnp.eye(4), atol=1e-6))

    if ok:
        print("KERNEL_OK")
    else:
        print("MISMATCH")
</pallas_src>

<mosaic_0001>
module attributes {stable_mosaic.version = 11 : i64} {
  func.func @_affine_kernel_2d(%arg0: memref<8xf32, #tpu.memory_space<smem>>, %arg1: memref<3x3xf32, #tpu.memory_space<smem>>) attributes {dimension_semantics = [], scalar_prefetch = 0 : i64, scratch_operands = 0 : i64, tpu.core_type = #tpu.core_type<tc>} {
    %c0 = arith.constant 0 : index
    %0 = memref.load %arg0[%c0] : memref<8xf32, #tpu.memory_space<smem>>
    %c1 = arith.constant 1 : index
    %1 = memref.load %arg0[%c1] : memref<8xf32, #tpu.memory_space<smem>>
    %c2 = arith.constant 2 : index
    %2 = memref.load %arg0[%c2] : memref<8xf32, #tpu.memory_space<smem>>
    %c3 = arith.constant 3 : index
    %3 = memref.load %arg0[%c3] : memref<8xf32, #tpu.memory_space<smem>>
    %c4 = arith.constant 4 : index
    %4 = memref.load %arg0[%c4] : memref<8xf32, #tpu.memory_space<smem>>
    %c5 = arith.constant 5 : index
    %5 = memref.load %arg0[%c5] : memref<8xf32, #tpu.memory_space<smem>>
    %c6 = arith.constant 6 : index
    %6 = memref.load %arg0[%c6] : memref<8xf32, #tpu.memory_space<smem>>
    %c7 = arith.constant 7 : index
    %7 = memref.load %arg0[%c7] : memref<8xf32, #tpu.memory_space<smem>>
    %cst = arith.constant 0.000000e+00 : f32
    %8 = arith.subf %cst, %5 : f32
    %9 = arith.mulf %2, %0 : f32
    %10 = arith.mulf %3, %1 : f32
    %11 = arith.mulf %4, %2 : f32
    %12 = arith.mulf %8, %3 : f32
    %13 = arith.mulf %4, %9 : f32
    %14 = arith.mulf %8, %10 : f32
    %15 = arith.addf %13, %14 : f32
    %16 = arith.mulf %5, %2 : f32
    %17 = arith.mulf %4, %3 : f32
    %18 = arith.mulf %5, %9 : f32
    %19 = arith.mulf %4, %10 : f32
    %20 = arith.addf %18, %19 : f32
    %21 = arith.mulf %6, %16 : f32
    %22 = arith.addf %11, %21 : f32
    %23 = arith.mulf %6, %17 : f32
    %24 = arith.addf %12, %23 : f32
    %25 = arith.mulf %6, %20 : f32
    %26 = arith.addf %15, %25 : f32
    %27 = arith.mulf %7, %11 : f32
    %28 = arith.addf %27, %16 : f32
    %29 = arith.mulf %7, %12 : f32
    %30 = arith.addf %29, %17 : f32
    %31 = arith.mulf %7, %15 : f32
    %32 = arith.addf %31, %20 : f32
    %c0_0 = arith.constant 0 : index
    %c0_1 = arith.constant 0 : index
    %33 = memref.load %arg1[%c0_0, %c0_1] : memref<3x3xf32, #tpu.memory_space<smem>>
    memref.store %22, %arg1[%c0_0, %c0_1] : memref<3x3xf32, #tpu.memory_space<smem>>
    %c0_2 = arith.constant 0 : index
    %c1_3 = arith.constant 1 : index
    %34 = memref.load %arg1[%c0_2, %c1_3] : memref<3x3xf32, #tpu.memory_space<smem>>
    memref.store %24, %arg1[%c0_2, %c1_3] : memref<3x3xf32, #tpu.memory_space<smem>>
    %c0_4 = arith.constant 0 : index
    %c2_5 = arith.constant 2 : index
    %35 = memref.load %arg1[%c0_4, %c2_5] : memref<3x3xf32, #tpu.memory_space<smem>>
    memref.store %26, %arg1[%c0_4, %c2_5] : memref<3x3xf32, #tpu.memory_space<smem>>
    %c1_6 = arith.constant 1 : index
    %c0_7 = arith.constant 0 : index
    %36 = memref.load %arg1[%c1_6, %c0_7] : memref<3x3xf32, #tpu.memory_space<smem>>
    memref.store %28, %arg1[%c1_6, %c0_7] : memref<3x3xf32, #tpu.memory_space<smem>>
    %c1_8 = arith.constant 1 : index
    %c1_9 = arith.constant 1 : index
    %37 = memref.load %arg1[%c1_8, %c1_9] : memref<3x3xf32, #tpu.memory_space<smem>>
    memref.store %30, %arg1[%c1_8, %c1_9] : memref<3x3xf32, #tpu.memory_space<smem>>
    %c1_10 = arith.constant 1 : index
    %c2_11 = arith.constant 2 : index
    %38 = memref.load %arg1[%c1_10, %c2_11] : memref<3x3xf32, #tpu.memory_space<smem>>
    memref.store %32, %arg1[%c1_10, %c2_11] : memref<3x3xf32, #tpu.memory_space<smem>>
    %cst_12 = arith.constant 0.000000e+00 : f32
    %c2_13 = arith.constant 2 : index
    %c0_14 = arith.constant 0 : index
    %39 = memref.load %arg1[%c2_13, %c0_14] : memref<3x3xf32, #tpu.memory_space<smem>>
    memref.store %cst_12, %arg1[%c2_13, %c0_14] : memref<3x3xf32, #tpu.memory_space<smem>>
    %cst_15 = arith.constant 0.000000e+00 : f32
    %c2_16 = arith.constant 2 : index
    %c1_17 = arith.constant 1 : index
    %40 = memref.load %arg1[%c2_16, %c1_17] : memref<3x3xf32, #tpu.memory_space<smem>>
    memref.store %cst_15, %arg1[%c2_16, %c1_17] : memref<3x3xf32, #tpu.memory_space<smem>>
    %cst_18 = arith.constant 1.000000e+00 : f32
    %c2_19 = arith.constant 2 : index
    %c2_20 = arith.constant 2 : index
    %41 = memref.load %arg1[%c2_19, %c2_20] : memref<3x3xf32, #tpu.memory_space<smem>>
    memref.store %cst_18, %arg1[%c2_19, %c2_20] : memref<3x3xf32, #tpu.memory_space<smem>>
    return
  }
}

</mosaic_0001>

<bundles_post_ra>
// kernel: affine_matrix_pallas.1
= control target key start
LH: loop header
LB: loop body
LE: loop exit
PB: predicated region body
PF: predicated region fallthrough
CT: control target
= control target key end

     0   :  { %s153_s0 = inlined_call_operand.vmem [shape: f32[8], index: 0, kind: input, shape index: {}]   ;;  %s154_s1 = inlined_call_operand.hbm [shape: f32[3,3], index: 1, kind: output, shape index: {}]  }
   0x1   :  { %156 = sst [smem:[#allocation8_spill]] %s154_s1 }
   0x2   :  { %6 = vsyncpa [#allocation4], 0 }
   0x3   :  { %7 = vsyncpa [#allocation3], 0  ;;  %s14_s8 = sshll.u32 %s153_s0, 4  ;;  %s15_s8 = int_to_ptr.vmem [resolvable:$true] %s14_s8 }
   0x4   :  { %s98_s9 = scalar_lea.vmem %s15_s8, 16  ;;  %p103_p1 = scmp.lt.s32.totalorder %s15_s8, %s15_s8 }
   0x5   :  { %p99_p0 = scmp.ne.s32.totalorder %s15_s8, %s98_s9  ;;  %p104_p2 = scmp.lt.s32.totalorder %s98_s9, %s98_s9 }
   0x7   :  { %p105_p3 = por %p104_p2, %p103_p1 }
   0x9   :  { %p106_p4 = pnand %p105_p3, %p99_p0 }
   0xb   :  { %109 = shalt.err (!%p106_p4)
}
   0xc   :  { %s124_s10 = smov [#allocation2]  }
   0xd   :  { %17 = dma.vmem_to_smem %s15_s8, 16, %s124_s10, [#allocation4]  }
   0xe   :  { %120 = dma.done.wait [#allocation4], 16  }
   0xf   :  { %121 = vsyncadd [#allocation4], 4294967280 }
  0x10   :  { %21 = sfence }
  0x11   :  { %s22_s11 = sld [smem:[#allocation2]]  ;;  %s87_s12 = sld [smem:[#allocation2 + $0x1]] }
  0x12   :  { %s88_s13 = sld [smem:[#allocation2 + $0x2]]  ;;  %s89_s14 = sld [smem:[#allocation2 + $0x3]] }
  0x13   :  { %s91_s15 = sld [smem:[#allocation2 + $0x5]]  ;;  %s90_s16 = sld [smem:[#allocation2 + $0x4]] }
  0x14   :  { %s125_s0 = smov 0.0   ;;  %s126_s18 = smov 1.0  }
  0x15   :  { %68 = sst [smem:[#allocation5 + $0x100]] %s125_s0  ;;  %s92_s21 = sld [smem:[#allocation2 + $0x6]] }
  0x16   :  { %70 = sst [smem:[#allocation5 + $0x101]] %s125_s0  ;;  %s93_s24 = sld [smem:[#allocation2 + $0x7]] }
  0x17   :  { %72 = sst [smem:[#allocation5 + $0x102]] %s126_s18 }
  0x18   :  { %s31_s17 = smul.f32 %s88_s13, %s22_s11 }
  0x19   :  { %s30_s19 = ssub.f32 0.0, %s91_s15  ;;  %s32_s20 = smul.f32 %s89_s14, %s87_s12 }
  0x1a   :  { %s33_s22 = smul.f32 %s90_s16, %s88_s13 }
  0x1b   :  { %s34_s23 = smul.f32 %s89_s14, %s30_s19 }
  0x1c   :  { %s35_s25 = smul.f32 %s90_s16, %s31_s17 }
  0x1d   :  { %s36_s26 = smul.f32 %s32_s20, %s30_s19 }
  0x1e   :  { %s38_s27 = smul.f32 %s91_s15, %s88_s13 }
  0x1f   :  { %s39_s28 = smul.f32 %s90_s16, %s89_s14  ;;  %s37_s2 = sadd.f32 %s36_s26, %s35_s25 }
  0x20   :  { %s40_s29 = smul.f32 %s91_s15, %s31_s17  ;;  %s157_s15 = sld [smem:[#allocation8_spill]] }
  0x21   :  { %s41_s30 = smul.f32 %s90_s16, %s32_s20 }
  0x22   :  { %s43_s3 = smul.f32 %s92_s21, %s38_s27 }
  0x23   :  { %s42_s4 = sadd.f32 %s41_s30, %s40_s29  ;;  %s45_s5 = smul.f32 %s92_s21, %s39_s28 }
  0x24   :  { %s44_s6 = sadd.f32 %s43_s3, %s33_s22  ;;  %s49_s7 = smul.f32 %s93_s24, %s33_s22 }
  0x25   :  { %s46_s8 = sadd.f32 %s45_s5, %s34_s23  ;;  %s47_s9 = smul.f32 %s92_s21, %s42_s4 }
  0x26   :  { %s50_s10 = sadd.f32 %s49_s7, %s38_s27  ;;  %s51_s11 = smul.f32 %s93_s24, %s34_s23 }
  0x27   :  { %s48_s12 = sadd.f32 %s47_s9, %s37_s2  ;;  %s53_s0 = smul.f32 %s93_s24, %s37_s2 }
  0x28   :  { %s52_s18 = sadd.f32 %s51_s11, %s39_s28  ;;  %s110_s16 = scalar_lea.hbm %s157_s15, 64 }
  0x29   :  { %s54_s1 = sadd.f32 %s53_s0, %s42_s4  ;;  %p111_p5 = scmp.ne.s32.totalorder %s157_s15, %s110_s16 }
  0x2a   :  { %56 = sst [smem:[#allocation5]] %s44_s6  ;;  %p114_p6 = scmp.lt.u32.totalorder %s110_s16, %s157_s15 }
  0x2b   :  { %58 = sst [smem:[#allocation5 + $0x1]] %s46_s8 }
  0x2c   :  { %60 = sst [smem:[#allocation5 + $0x2]] %s48_s12  ;;  %p116_p7 = pnand %p114_p6, %p111_p5 }
  0x2d   :  { %62 = sst [smem:[#allocation5 + $0x80]] %s50_s10 }
  0x2e   :  { %64 = sst [smem:[#allocation5 + $0x81]] %s52_s18 }
  0x2f   :  { %66 = sst [smem:[#allocation5 + $0x82]] %s54_s1 }
  0x30   :  { %119 = shalt.err (!%p116_p7)
}
  0x31   :  { %s127_s22 = smov [#allocation5]  }
  0x32   :  { %80 = dma.smem_to_hbm %s127_s22, 64, %s157_s15, [#allocation3]  }
  0x33   :  { %122 = dma.done.wait [#allocation3], 64  }
  0x34   :  { %123 = vsyncadd [#allocation3], 4294967232 }
  0x35   :  { %84 = sfence }
  0x36   :  { %85 = vsyncpa [#allocation3], 1 }
  0x37   :  { %86 = vsyncpa [#allocation4], 1 }

</bundles_post_ra>
